<compile_context>
chip_gen: v6e
topology: v6e:2x2x1
jax: 0.10.0
libtpu: 0.0.40
codegen_flags: <defaults>
</compile_context>

<pallas_src>
import functools

import jax
import jax.numpy as jnp
from jax.experimental import pallas as pl
from jax.experimental.pallas import tpu as pltpu


def _round_up(a, b):
    return (a + b - 1) // b * b


def _vmem_capacity_bytes():
    try:
        info = pltpu.get_tpu_info()
        return int(getattr(info, "vmem_capacity_bytes", 64 * 1024 * 1024))
    except Exception:
        return 64 * 1024 * 1024  # conservative (v7x per-TC) fallback


def _block_vmem_bytes(tile_l, Kp, Np, itemsize):
    """Conservative VMEM footprint for one pipelined grid step."""
    return (2 * (Kp + Np) * tile_l * itemsize   # input + output double buffers
            + 2 * Np * Kp * itemsize            # resident weight (2 bufs, fetched once)
            + 2 * Np * 128 * 4)                 # bias column, lane-padded, f32


def _choose_l_tiling(L, B, Kp, Np, itemsize, budget):
    """Pick (tile_l, Lp): spatial lane tile and padded spatial length."""
    if L <= 256:
        return L, L  # single full (unpadded) tile per batch element
    Lp_full = _round_up(L, 128)
    if _block_vmem_bytes(Lp_full, Kp, Np, itemsize) <= budget:
        if B >= 2:
            return Lp_full, Lp_full            # whole padded row per grid step
        # B == 1: split the row so both v7x TensorCores get work.
        t = _round_up(max(Lp_full // 2, 128), 128)
        return t, _round_up(L, t)
    best = None
    for t in range(2048, 0, -128):             # largest 128-multiple that fits
        if _block_vmem_bytes(t, Kp, Np, itemsize) > budget:
            continue
        Lp = _round_up(L, t)
        if (Lp - L) * 8 <= L:                  # accept <= 12.5% zero-pad inflation
            return t, Lp
        if best is None or Lp < best[1]:
            best = (t, Lp)
    return best if best is not None else (128, _round_up(L, 128))


def _patch_proj_kernel(x_ref, w_ref, b_ref, o_ref):
    # x_ref: (1, Kp, tl)  patch columns for one batch element (K on sublanes)
    # w_ref: (Np, Kp)     VMEM-resident projection weight
    # b_ref: (Np, 1)      bias column, f32
    # o_ref: (1, Np, tl)  NCHW-layout output tile (embed_dim on sublanes)
    acc = jnp.dot(w_ref[...], x_ref[0], preferred_element_type=jnp.float32)
    o_ref[0] = (acc + b_ref[...]).astype(o_ref.dtype)


@functools.partial(jax.jit, static_argnames=("patch_size",))
def patch_embed(x, weight, bias, *, patch_size):
    """x: (B, C, H, W) NCHW; weight: (embed_dim, C, ph, pw); bias: (embed_dim,)."""
    B, C, H, W = x.shape
    ph, pw = patch_size
    N = weight.shape[0]
    Ho, Wo = H // ph, W // pw
    L = Ho * Wo
    K = C * ph * pw
    itemsize = jnp.dtype(x.dtype).itemsize

    # --- padding / tiling decisions -----------------------------------------
    Np = _round_up(N, 128)                     # lane-pad embed_dim
    Kp = K
    if K >= 128:                               # pad K only when cheap (<=12.5%)
        cand = _round_up(K, 128)
        if (cand - K) * 8 <= K:
            Kp = cand

    vmem_cap = _vmem_capacity_bytes()
    budget = int(vmem_cap * 0.45)
    tile_l, Lp = _choose_l_tiling(L, B, Kp, Np, itemsize, budget)
    need = _block_vmem_bytes(tile_l, Kp, Np, itemsize)
    vmem_limit = int(min(0.9 * vmem_cap, max(32 * 1024 * 1024, 2 * need)))

    # --- glue: patches in transposed (K-major) layout, matches NCHW output ---
    # (B, C, Ho, ph, Wo, pw) -> (B, C, ph, pw, Ho, Wo) -> (B, K, L)
    xt = x.reshape(B, C, Ho, ph, Wo, pw).transpose(0, 1, 3, 5, 2, 4).reshape(B, K, L)
    if Kp != K or Lp != L:
        xt = jnp.pad(xt, ((0, 0), (0, Kp - K), (0, Lp - L)))

    # Conv weight (N, C, ph, pw) -> (N, K); flattening order matches xt's K axis.
    w_nk = weight.reshape(N, K).astype(x.dtype)
    b_col = bias.astype(jnp.float32)
    if Kp != K:
        w_nk = jnp.pad(w_nk, ((0, 0), (0, Kp - K)))
    if Np != N:
        w_nk = jnp.pad(w_nk, ((0, Np - N), (0, 0)))
        b_col = jnp.pad(b_col, ((0, Np - N),))
    b_col = b_col.reshape(Np, 1)

    grid = (B, Lp // tile_l)
    cost = pl.CostEstimate(
        flops=2 * B * Lp * Kp * Np,
        transcendentals=0,
        bytes_accessed=(B * Kp * Lp + B * Np * Lp + Np * Kp) * itemsize + Np * 4,
    )

    # --- hot path: resident-weight matmul + bias, NCHW output ----------------
    out = pl.pallas_call(
        _patch_proj_kernel,
        out_shape=jax.ShapeDtypeStruct((B, Np, Lp), x.dtype),
        grid_spec=pltpu.PrefetchScalarGridSpec(
            num_scalar_prefetch=0,
            grid=grid,
            in_specs=[
                pl.BlockSpec((1, Kp, tile_l), lambda b, t: (b, 0, t)),  # patches stream
                pl.BlockSpec((Np, Kp), lambda b, t: (0, 0)),            # resident weight
                pl.BlockSpec((Np, 1), lambda b, t: (0, 0)),             # resident bias
            ],
            out_specs=pl.BlockSpec((1, Np, tile_l), lambda b, t: (b, 0, t)),
        ),
        compiler_params=pltpu.CompilerParams(
            dimension_semantics=("parallel", "parallel"),
            allow_input_fusion=[True, False, False],
            vmem_limit_bytes=vmem_limit,
        ),
        cost_estimate=cost,
    )(xt, w_nk, b_col)

    # --- glue: strip padding; reshape (no transpose) to NCHW conv output -----
    out = out[:, :N, :L].reshape(B, N, Ho, Wo)
    return out


def _reference(x, weight, bias, patch_size):
    """Pure-JAX reference: Conv2d with kernel=stride=patch_size (NCHW)."""
    y = jax.lax.conv_general_dilated(
        x, weight,
        window_strides=patch_size,
        padding="VALID",
        dimension_numbers=("NCHW", "OIHW", "NCHW"),
    )
    return y + bias.reshape(1, -1, 1, 1)


if __name__ == "__main__":
    # Small configuration consistent with the module: img_size=16, patch_size=4,
    # in_chans=4, embed_dim=32, batch=2 -> patches_resolution=(4,4), 16 patches.
    B, C, H, W = 2, 4, 16, 16
    patch_size = (4, 4)
    embed_dim = 32

    key = jax.random.PRNGKey(0)
    kx, kw, kb = jax.random.split(key, 3)

    x = jax.random.normal(kx, (B, C, H, W), dtype=jnp.float32)
    fan_in = C * patch_size[0] * patch_size[1]
    weight = jax.random.normal(
        kw, (embed_dim, C, patch_size[0], patch_size[1]), dtype=jnp.float32
    ) / jnp.sqrt(float(fan_in))
    bias = jax.random.normal(kb, (embed_dim,), dtype=jnp.float32) * 0.01

    y = patch_embed(x, weight, bias, patch_size=patch_size)
    y = jax.block_until_ready(y)

    y_ref = _reference(x, weight, bias, patch_size)
    assert y.shape == (B, embed_dim, H // patch_size[0], W // patch_size[1])
    assert jnp.allclose(y, y_ref, atol=1e-4, rtol=1e-4), "mismatch vs conv reference"

    print("KERNEL_OK")
</pallas_src>

<mosaic_0001>
module attributes {stable_mosaic.version = 11 : i64} {
  func.func @_patch_proj_kernel(%arg0: i32, %arg1: i32, %arg2: memref<1x64x16xf32, #tpu.memory_space<vmem>>, %arg3: memref<128x64xf32, #tpu.memory_space<vmem>>, %arg4: memref<128x1xf32, #tpu.memory_space<vmem>>, %arg5: memref<1x128x16xf32, #tpu.memory_space<vmem>>) attributes {dimension_semantics = [#tpu.dimension_semantics<parallel>, #tpu.dimension_semantics<parallel>], iteration_bounds = array<i64: 2, 1>, scalar_prefetch = 0 : i64, scratch_operands = 0 : i64, tpu.core_type = #tpu.core_type<tc>, window_params = [{transform_indices = @transform_0, window_bounds = array<i64: 1, 64, 16>}, {pipeline_mode = #tpu.pipeline_mode<synchronous>, transform_indices = @transform_1, window_bounds = array<i64: 128, 64>}, {pipeline_mode = #tpu.pipeline_mode<synchronous>, transform_indices = @transform_2, window_bounds = array<i64: 128, 1>}, {transform_indices = @transform_3, window_bounds = array<i64: 1, 128, 16>}]} {
    %c0 = arith.constant 0 : index
    %c0_0 = arith.constant 0 : index
    %0 = vector.load %arg3[%c0, %c0_0] : memref<128x64xf32, #tpu.memory_space<vmem>>, vector<128x64xf32>
    %c0_1 = arith.constant 0 : index
    %c0_2 = arith.constant 0 : index
    %c0_3 = arith.constant 0 : index
    %1 = vector.load %arg2[%c0_1, %c0_2, %c0_3] : memref<1x64x16xf32, #tpu.memory_space<vmem>>, vector<1x64x16xf32>
    %2 = vector.shape_cast %1 : vector<1x64x16xf32> to vector<64x16xf32>
    %cst = arith.constant dense<0.000000e+00> : vector<128x16xf32>
    %3 = tpu.matmul %0, %2, %cst {dimension_numbers = #tpu.dot_dimension_numbers<[1], [0], [0], [1], [0, 0, 1, 1], [], []>} : vector<128x64xf32>, vector<64x16xf32>, vector<128x16xf32> -> vector<128x16xf32>
    %c0_4 = arith.constant 0 : index
    %c0_5 = arith.constant 0 : index
    %4 = vector.load %arg4[%c0_4, %c0_5] : memref<128x1xf32, #tpu.memory_space<vmem>>, vector<128x1xf32>
    %5 = vector.broadcast %4 : vector<128x1xf32> to vector<128x16xf32>
    %6 = arith.addf %3, %5 : vector<128x16xf32>
    %c0_6 = arith.constant 0 : index
    %c0_7 = arith.constant 0 : index
    %c0_8 = arith.constant 0 : index
    %7 = vector.load %arg5[%c0_6, %c0_7, %c0_8] : memref<1x128x16xf32, #tpu.memory_space<vmem>>, vector<1x128x16xf32>
    %8 = vector.shape_cast %7 : vector<1x128x16xf32> to vector<128x16xf32>
    %9 = vector.shape_cast %6 : vector<128x16xf32> to vector<1x128x16xf32>
    tpu.vector_store %arg5[%c0_6, %c0_7, %c0_8], %9 {strides = array<i32>} : memref<1x128x16xf32, #tpu.memory_space<vmem>>, vector<1x128x16xf32>,
    return
  }
  func.func @transform_0(%arg0: i32, %arg1: i32) -> (i32, i32, i32) {
    %c0_i32 = arith.constant 0 : i32
    %c0_i32_0 = arith.constant 0 : i32
    return %arg0, %c0_i32, %arg1 : i32, i32, i32
  }
  func.func @transform_1(%arg0: i32, %arg1: i32) -> (i32, i32) {
    %c0_i32 = arith.constant 0 : i32
    %c0_i32_0 = arith.constant 0 : i32
    %c0_i32_1 = arith.constant 0 : i32
    return %c0_i32, %c0_i32_0 : i32, i32
  }
  func.func @transform_2(%arg0: i32, %arg1: i32) -> (i32, i32) {
    %c0_i32 = arith.constant 0 : i32
    %c0_i32_0 = arith.constant 0 : i32
    %c0_i32_1 = arith.constant 0 : i32
    return %c0_i32, %c0_i32_0 : i32, i32
  }
  func.func @transform_3(%arg0: i32, %arg1: i32) -> (i32, i32, i32) {
    %c0_i32 = arith.constant 0 : i32
    %c0_i32_0 = arith.constant 0 : i32
    return %arg0, %c0_i32, %arg1 : i32, i32, i32
  }
}

</mosaic_0001>

<bundles_post_ra>
// kernel: patch_embed.1
= control target key start
LH: loop header
LB: loop body
LE: loop exit
PB: predicated region body
PF: predicated region fallthrough
CT: control target
= control target key end

     0   :  { %s797_s12 = smov 0   ;;  %s799_s13 = smov 0   ;;  %s990_s0 = inlined_call_operand.vmem [shape: f32[2,64,16], index: 0, kind: input, shape index: {}]   ;;  %s991_s1 = inlined_call_operand.vmem [shape: f32[128,64], index: 1, kind: input, shape index: {}]   ;;  %s992_s2 = inlined_call_operand.vmem [shape: f32[128,1], index: 2, kind: input, shape index: {}]   ;;  %s993_s3 = inlined_call_operand.vmem [shape: f32[2,128,16], index: 3, kind: output, shape index: {}]  }
   0x1   :  { %s801_s14 = smov 0  }
   0x2 LB: > { %s25_s15 = sadd.s32 1, %s770_s13  ;;  %p620_p0 = scmp.ge.s32.totalorder %s774_s14, 1  ;;  %s774_s14 = sphi %s801_s14, %s13_s14   ;;  %s770_s13 = sphi %s799_s13, %s995_s13   ;;  %s766_s12 = sphi %s797_s12, %s994_s12  }
   0x3   : > { %p27_p1 = scmp.ge.s32.totalorder %s25_s15, 2  ;;  %p156_p2 = scmp.lt.s32.totalorder %s774_s14, 3 }
   0x5   : > { %s997_s15 = smov (%p27_p1, %s25_s15), 0  ;;  %p157_p3 = pnand %p620_p0, %p156_p2 }
   0x6   : > { %p186_p4 = scmp.lt.s32.totalorder (!%p157_p3), %s766_s12, 1 }
   0x7   : > { %160 = sbr.rel (%p157_p3) target bundleno = 242 (0xf2), region = 32 }
   0xc   : > { %v202_v0 = vld [vmem:[%s991_s1] sm:$0xff]  ;;  %vm322_vm0 = vcmask 523264   ;;  %s999_s12 = smov (!%p186_p4, %s766_s12), 1  ;;  %v776_v2 = vmov 0   ;;  %v228_v3 = vld [vmem:[%s992_s2 + $0x10] sm:$0xff]  ;;  %v203_v13 = vld [vmem:[%s991_s1 + $0x8] sm:$0xff] }
   0xd   : > { %v210_v1 = vld [vmem:[%s991_s1 + $0x40] sm:$0xff]  ;;  %685 = vmatprep.mubr.msk.f32.mxu0 %vm322_vm0, %v202_v0  ;;  %751 = vset.pattern.permute.xlu1 %v776_v2  ;;  %s643_s20 = sshll.u32 %s999_s12, 6  ;;  %v211_v14 = vld [vmem:[%s991_s1 + $0x48] sm:$0xff]  ;;  %v204_v15 = vld [vmem:[%s991_s1 + $0x10] sm:$0xff]  ;;  %s644_s11 = sshll.u32 %s999_s12, 7  ;;  %vm516_vm1 = vcmask 130048  }
   0xe   : > { %697 = vmatprep.mubr.msk.f32.mxu1 %vm322_vm0, %v210_v1  ;;  %750 = vset.pattern.permute.xlu0 %v776_v2  ;;  %s829_s23 = scalar_lea.vmem %s990_s0, %s643_s20  ;;  %v226_v4 = vld [vmem:[%s992_s2] sm:$0xff]  ;;  %v212_v16 = vld [vmem:[%s991_s1 + $0x50] sm:$0xff]  ;;  %v229_v17 = vld [vmem:[%s992_s2 + $0x18] sm:$0xff]  ;;  %s947_s18 = scalar_lea.vmem %s993_s3, %s644_s11 }
   0xf   : > { %v225_v5 = vld [vmem:[%s829_s23 + $0x38] sm:$0xff]  ;;  %v224_v6 = vld [vmem:[%s829_s23 + $0x30] sm:$0xff]  ;;  %254 = vperm.xlu1 %751, %v228_v3   ;;  %244 = vperm.xlu0 %750, %v226_v4   ;;  %v223_v7 = vld [vmem:[%s829_s23 + $0x28] sm:$0xff] }
  0x10   : > { %669 = vmatprep.subr.mxu0 %v225_v5  ;;  %709 = vmatprep.subr.mxu1 %v225_v5  ;;  %v222_v8 = vld [vmem:[%s829_s23 + $0x20] sm:$0xff]  ;;  %v221_v9 = vld [vmem:[%s829_s23 + $0x18] sm:$0xff]  ;;  %v220_v10 = vld [vmem:[%s829_s23 + $0x10] sm:$0xff] }
  0x11   : > { %670 = vmatpush3.msra.mxu0 %v225_v5  ;;  %717 = vmatpush3.msra.mxu1 %v225_v5  ;;  %v219_v11 = vld [vmem:[%s829_s23 + $0x8] sm:$0xff]  ;;  %v218_v12 = vld [vmem:[%s829_s23] sm:$0xff]  ;;  %v205_v19 = vld [vmem:[%s991_s1 + $0x18] sm:$0xff] }
  0x12   : > { %671 = vmatprep.subr.mxu0 %v224_v6  ;;  %710 = vmatprep.subr.mxu1 %v224_v6  ;;  %v227_v18 = vld [vmem:[%s992_s2 + $0x8] sm:$0xff]  ;;  %v213_v20 = vld [vmem:[%s991_s1 + $0x58] sm:$0xff]  ;;  %v206_v21 = vld [vmem:[%s991_s1 + $0x20] sm:$0xff] }
  0x13   : > { %672 = vmatpush3.msra.mxu0 %v224_v6  ;;  %718 = vmatpush3.msra.mxu1 %v224_v6  ;;  %v214_v22 = vld [vmem:[%s991_s1 + $0x60] sm:$0xff]  ;;  %v231_v23 = vld [vmem:[%s992_s2 + $0x28] sm:$0xff]  ;;  %v208_v27 = vld [vmem:[%s991_s1 + $0x30] sm:$0xff] }
  0x14   : > { %673 = vmatprep.subr.mxu0 %v223_v7  ;;  %711 = vmatprep.subr.mxu1 %v223_v7  ;;  %v230_v24 = vld [vmem:[%s992_s2 + $0x20] sm:$0xff]  ;;  %v207_v25 = vld [vmem:[%s991_s1 + $0x28] sm:$0xff]  ;;  %v216_v28 = vld [vmem:[%s991_s1 + $0x70] sm:$0xff] }
  0x15   : > { %674 = vmatpush3.msra.mxu0 %v223_v7  ;;  %719 = vmatpush3.msra.mxu1 %v223_v7  ;;  %v215_v26 = vld [vmem:[%s991_s1 + $0x68] sm:$0xff]  ;;  %v233_v29 = vld [vmem:[%s992_s2 + $0x38] sm:$0xff]  ;;  %v232_v30 = vld [vmem:[%s992_s2 + $0x30] sm:$0xff] }
  0x16   : > { %675 = vmatprep.subr.mxu0 %v222_v8  ;;  %712 = vmatprep.subr.mxu1 %v222_v8  ;;  %v209_v31 = vld [vmem:[%s991_s1 + $0x38] sm:$0xff]  ;;  %v235_v33 = vld [vmem:[%s992_s2 + $0x48] sm:$0xff]  ;;  %v234_v34 = vld [vmem:[%s992_s2 + $0x40] sm:$0xff] }
  0x17   : > { %676 = vmatpush3.msra.mxu0 %v222_v8  ;;  %720 = vmatpush3.msra.mxu1 %v222_v8  ;;  %v217_v32 = vld [vmem:[%s991_s1 + $0x78] sm:$0xff]  ;;  %v236_v36 = vld [vmem:[%s992_s2 + $0x50] sm:$0xff]  ;;  %v239_v37 = vld [vmem:[%s992_s2 + $0x68] sm:$0xff] }
  0x18   : > { %677 = vmatprep.subr.mxu0 %v221_v9  ;;  %713 = vmatprep.subr.mxu1 %v221_v9  ;;  %v237_v35 = vld [vmem:[%s992_s2 + $0x58] sm:$0xff]  ;;  %v238_v38 = vld [vmem:[%s992_s2 + $0x60] sm:$0xff]  ;;  %v240_v40 = vld [vmem:[%s992_s2 + $0x70] sm:$0xff] }
  0x19   : > { %678 = vmatpush3.msra.mxu0 %v221_v9  ;;  %721 = vmatpush3.msra.mxu1 %v221_v9  ;;  %v241_v39 = vld [vmem:[%s992_s2 + $0x78] sm:$0xff] }
  0x1a   : > { %679 = vmatprep.subr.mxu0 %v220_v10  ;;  %714 = vmatprep.subr.mxu1 %v220_v10 }
  0x1b   : > { %680 = vmatpush3.msra.mxu0 %v220_v10  ;;  %722 = vmatpush3.msra.mxu1 %v220_v10 }
  0x1c   : > { %681 = vmatprep.subr.mxu0 %v219_v11  ;;  %715 = vmatprep.subr.mxu1 %v219_v11 }
  0x1d   : > { %682 = vmatpush3.msra.mxu0 %v219_v11  ;;  %723 = vmatpush3.msra.mxu1 %v219_v11 }
  0x1e   : > { %683 = vmatprep.subr.mxu0 %v218_v12  ;;  %716 = vmatprep.subr.mxu1 %v218_v12 }
  0x1f   : > { %684 = vmatpush3.msra.mxu0 %v218_v12  ;;  %724 = vmatpush3.msra.mxu1 %v218_v12 }
  0x20   : > { %686 = vmatmul.mubr.msk.f32.vlgmr.msra.gmra.mxu0 %vm322_vm0, %v203_v13  ;;  %698 = vmatmul.mubr.msk.f32.vlgmr.msra.gmra.mxu1 %vm322_vm0, %v211_v14 }
  0x21   : > { %688 = vmatprep.mubr.msk.f32.mxu0 %vm322_vm0, %v204_v15  ;;  %700 = vmatprep.mubr.msk.f32.mxu1 %vm322_vm0, %v212_v16 }
  0x22   : > { %259 = vperm.xlu1 %751, %v229_v17   ;;  %249 = vperm.xlu0 %750, %v227_v18  }
  0x24   : > { %689 = vmatmul.mubr.msk.f32.gmra.mxu0 %vm322_vm0, %v205_v19  ;;  %701 = vmatmul.mubr.msk.f32.gmra.mxu1 %vm322_vm0, %v213_v20 }
  0x25   : > { %691 = vmatprep.mubr.msk.f32.mxu0 %vm322_vm0, %v206_v21  ;;  %703 = vmatprep.mubr.msk.f32.mxu1 %vm322_vm0, %v214_v22 }
  0x26   : > { %269 = vperm.xlu1 %751, %v231_v23   ;;  %264 = vperm.xlu0 %750, %v230_v24  }
  0x28   : > { %692 = vmatmul.mubr.msk.f32.gmra.mxu0 %vm322_vm0, %v207_v25  ;;  %704 = vmatmul.mubr.msk.f32.gmra.mxu1 %vm322_vm0, %v215_v26 }
  0x29   : > { %694 = vmatprep.mubr.msk.f32.mxu0 %vm322_vm0, %v208_v27  ;;  %706 = vmatprep.mubr.msk.f32.mxu1 %vm322_vm0, %v216_v28 }
  0x2a   : > { %279 = vperm.xlu1 %751, %v233_v29   ;;  %274 = vperm.xlu0 %750, %v232_v30  }
  0x2c   : > { %695 = vmatmul.mubr.msk.f32.gmra.mxu0 %vm322_vm0, %v209_v31  ;;  %707 = vmatmul.mubr.msk.f32.gmra.mxu1 %vm322_vm0, %v217_v32 }
  0x2e   : > { %289 = vperm.xlu1 %751, %v235_v33   ;;  %284 = vperm.xlu0 %750, %v234_v34  }
  0x32   : > { %299 = vperm.xlu1 %751, %v237_v35   ;;  %294 = vperm.xlu0 %750, %v236_v36  }
  0x36   : > { %309 = vperm.xlu1 %751, %v239_v37   ;;  %304 = vperm.xlu0 %750, %v238_v38  }
  0x3a   : > { %319 = vperm.xlu1 %751, %v241_v39   ;;  %314 = vperm.xlu0 %750, %v240_v40  }
  0x8a   : > { %v255_v41 = vpop.permute.xlu1 %254  ;;  %v245_v42 = vpop.permute.xlu0 %244 }
  0x9d   : > { %v260_v43 = vpop.permute.xlu1 %259  ;;  %v250_v44 = vpop.permute.xlu0 %249 }
  0xa1   : > { %v270_v45 = vpop.permute.xlu1 %269  ;;  %v265_v46 = vpop.permute.xlu0 %264 }
  0xa5   : > { %v280_v47 = vpop.permute.xlu1 %279  ;;  %v275_v48 = vpop.permute.xlu0 %274 }
  0xa9   : > { %v290_v49 = vpop.permute.xlu1 %289  ;;  %v285_v50 = vpop.permute.xlu0 %284 }
  0xad   : > { %v300_v51 = vpop.permute.xlu1 %299  ;;  %v295_v54 = vpop.permute.xlu0 %294 }
  0xb1   : > { %v310_v63 = vpop.permute.xlu1 %309  ;;  %v305_v4 = vpop.permute.xlu0 %304 }
  0xb5   : > { %v320_v13 = vpop.permute.xlu1 %319  ;;  %v315_v18 = vpop.permute.xlu0 %314 }
  0xe0   : > { %v687_v52 = vpop.f32.mrf.mxu0  ;;  %v699_v53 = vpop.f32.mrf.mxu1 }
  0xe1   : > { %v443_v55 = vadd.f32 %v687_v52, %v250_v44  ;;  %v483_v56 = vadd.f32 %v699_v53, %v290_v49 }
  0xe2   : > { %v437_v57 = vpop.f32.mrf.mxu0  ;;  %v477_v58 = vpop.f32.mrf.mxu1 }
  0xe3   : > { %518 = vst.msk [vmem:[%s947_s18 + $0x8] sm:$0xff] %vm516_vm1, %v443_v55  ;;  %526 = vst.msk [vmem:[%s947_s18 + $0x48] sm:$0xff] %vm516_vm1, %v483_v56  ;;  %v438_v59 = vadd.f32 %v437_v57, %v245_v42  ;;  %v478_v60 = vadd.f32 %v477_v58, %v285_v50 }
  0xe4   : > { %v690_v61 = vpop.f32.mrf.mxu0  ;;  %v702_v62 = vpop.f32.mrf.mxu1 }
  0xe5   : > { %517 = vst.msk [vmem:[%s947_s18] sm:$0xff] %vm516_vm1, %v438_v59  ;;  %525 = vst.msk [vmem:[%s947_s18 + $0x40] sm:$0xff] %vm516_vm1, %v478_v60  ;;  %v453_v0 = vadd.f32 %v690_v61, %v260_v43  ;;  %v493_v1 = vadd.f32 %v702_v62, %v300_v51 }
  0xe6   : > { %v447_v2 = vpop.f32.mrf.mxu0  ;;  %v487_v3 = vpop.f32.mrf.mxu1 }
  0xe7   : > { %520 = vst.msk [vmem:[%s947_s18 + $0x18] sm:$0xff] %vm516_vm1, %v453_v0  ;;  %528 = vst.msk [vmem:[%s947_s18 + $0x58] sm:$0xff] %vm516_vm1, %v493_v1  ;;  %v448_v5 = vadd.f32 %v447_v2, %v255_v41  ;;  %v488_v6 = vadd.f32 %v487_v3, %v295_v54 }
  0xe8   : > { %v693_v7 = vpop.f32.mrf.mxu0  ;;  %v705_v8 = vpop.f32.mrf.mxu1 }
  0xe9   : > { %519 = vst.msk [vmem:[%s947_s18 + $0x10] sm:$0xff] %vm516_vm1, %v448_v5  ;;  %527 = vst.msk [vmem:[%s947_s18 + $0x50] sm:$0xff] %vm516_vm1, %v488_v6  ;;  %v463_v9 = vadd.f32 %v693_v7, %v270_v45  ;;  %v503_v10 = vadd.f32 %v705_v8, %v310_v63 }
  0xea   : > { %v457_v11 = vpop.f32.mrf.mxu0  ;;  %v497_v12 = vpop.f32.mrf.mxu1 }
  0xeb   : > { %522 = vst.msk [vmem:[%s947_s18 + $0x28] sm:$0xff] %vm516_vm1, %v463_v9  ;;  %530 = vst.msk [vmem:[%s947_s18 + $0x68] sm:$0xff] %vm516_vm1, %v503_v10  ;;  %v458_v14 = vadd.f32 %v457_v11, %v265_v46  ;;  %v498_v15 = vadd.f32 %v497_v12, %v305_v4 }
  0xec   : > { %v696_v16 = vpop.f32.mrf.mxu0  ;;  %v708_v17 = vpop.f32.mrf.mxu1 }
  0xed   : > { %521 = vst.msk [vmem:[%s947_s18 + $0x20] sm:$0xff] %vm516_vm1, %v458_v14  ;;  %529 = vst.msk [vmem:[%s947_s18 + $0x60] sm:$0xff] %vm516_vm1, %v498_v15  ;;  %v473_v19 = vadd.f32 %v696_v16, %v280_v47  ;;  %v513_v20 = vadd.f32 %v708_v17, %v320_v13 }
  0xee   : > { %v467_v21 = vpop.f32.mrf.mxu0  ;;  %v507_v22 = vpop.f32.mrf.mxu1 }
  0xef   : > { %524 = vst.msk [vmem:[%s947_s18 + $0x38] sm:$0xff] %vm516_vm1, %v473_v19  ;;  %532 = vst.msk [vmem:[%s947_s18 + $0x78] sm:$0xff] %vm516_vm1, %v513_v20  ;;  %v468_v23 = vadd.f32 %v467_v21, %v275_v48  ;;  %v508_v24 = vadd.f32 %v507_v22, %v315_v18 }
  0xf1   : > { %523 = vst.msk [vmem:[%s947_s18 + $0x30] sm:$0xff] %vm516_vm1, %v468_v23  ;;  %531 = vst.msk [vmem:[%s947_s18 + $0x70] sm:$0xff] %vm516_vm1, %v508_v24 }
  0xf2 PF: > { %s13_s14 = sadd.s32 1, %s774_s14   ;;  %s994_s12 = smov %s770_s13 }
  0xf3   : > { %p10_p5 = scmp.ge.s32.totalorder %s13_s14, 4   ;;  %s995_s13 = smov %s997_s15 }
  0xf5   :  { %12 = sbr.rel (!%p10_p5) target bundleno = 2 (0x2), region = 62 }

</bundles_post_ra>
